<compile_context>
chip_gen: v7x
topology: tpu7x:2x2x1
jax: 0.10.0
libtpu: 0.0.40
codegen_flags: <defaults>
</compile_context>

<pallas_src>
import functools
import math
from typing import Any, NamedTuple

import numpy as np

import jax
import jax.numpy as jnp
from jax.experimental import pallas as pl
from jax.experimental.pallas import tpu as pltpu


def _round_up(x: int, m: int) -> int:
    return (x + m - 1) // m * m


def _apply_act(y, act: str):
    act = act.upper()
    if act == "RELU":
        return jnp.maximum(y, 0.0)
    if act == "SIGMOID":
        return jax.nn.sigmoid(y)
    if act == "TANH":
        return jnp.tanh(y)
    if act == "LINEAR":
        return y
    raise ValueError("Un-defined activation type %s" % act)


def _default_batch_tile() -> int:
    """256 fills the 256-wide MXU on v6e/v7x; v5e's 4x128x128 MXU wants 128."""
    try:
        kind = jax.devices()[0].device_kind.lower()
    except Exception:  # pragma: no cover - defensive
        kind = ""
    return 128 if "v5" in kind else 256


# --------------------------------------------------------------------------- #
# Kernel
# --------------------------------------------------------------------------- #
def _fused_mlp_kernel(x_ref, *refs, acts, compute_dtype):
    """Fused MLP over one batch tile.

    refs = (w0, b0, w1, b1, ..., w_{L-1}, b_{L-1}, o_ref).
    Layers are unrolled at trace time; intermediates stay in vregs/VMEM.
    """
    n_layers = len(acts)
    o_ref = refs[-1]
    h = x_ref[...]                                    # native dtype; cast below
    for l in range(n_layers):
        w = refs[2 * l][...]                          # (Din_pad, Dout_pad) compute_dtype
        b = refs[2 * l + 1][...]                      # (1, Dout_pad) f32, row-broadcast
        y = jnp.dot(h.astype(compute_dtype), w,
                    preferred_element_type=jnp.float32) + b
        h = _apply_act(y, acts[l])                    # elementwise/EUP math in f32
    o_ref[...] = h.astype(o_ref.dtype)


# --------------------------------------------------------------------------- #
# Parameter preparation (done ONCE, outside the forward)
# --------------------------------------------------------------------------- #
class PreparedMLP(NamedTuple):
    flat_wb: tuple          # (w0, b0, w1, b1, ...) already zero-padded / cast
    dpad: tuple             # padded feature dims, including input dim
    acts: tuple             # activation name (upper) per layer
    in_features: int
    out_features: int
    compute_dtype: Any


def prepare_fully_connected(params, input_dim, acts, *,
                            compute_dtype=jnp.bfloat16) -> PreparedMLP:
    """Zero-pad weights/biases to (8,128)-friendly shapes and cast weights.

    Hoisted out of the forward so repeated calls don't re-materialize padded
    copies of every weight (an extra HBM read+write per call otherwise).
    """
    assert len(params) == len(acts)
    dims = [w.shape[1] for (w, _) in params]
    dpad = [_round_up(input_dim, 128)] + [_round_up(d, 128) for d in dims]

    flat = []
    for l, (w, b) in enumerate(params):
        din, dout = w.shape
        w_p = (jnp.zeros((dpad[l], dpad[l + 1]), jnp.float32)
               .at[:din, :dout].set(w.astype(jnp.float32))
               .astype(compute_dtype))
        # Bias stays f32 (added post-accumulation); zero padding is what makes
        # the padded-lane annihilation argument hold — keep it zero.
        b_p = (jnp.zeros((1, dpad[l + 1]), jnp.float32)
               .at[:, :dout].set(jnp.reshape(b, (1, dout)).astype(jnp.float32)))
        flat += [w_p, b_p]

    return PreparedMLP(tuple(flat), tuple(dpad),
                       tuple(a.upper() for a in acts),
                       input_dim, dims[-1], compute_dtype)


# --------------------------------------------------------------------------- #
# Forward
# --------------------------------------------------------------------------- #
def _resident_spec(shape, single_buffer: bool) -> pl.BlockSpec:
    """BlockSpec for a weight/bias that stays VMEM-resident across the grid."""
    if single_buffer:
        # Constant index_map -> never re-fetched; one buffer is enough.
        return pl.BlockSpec(shape, lambda i: (0, 0), pipeline_mode=pl.Buffered(1))
    return pl.BlockSpec(shape, lambda i: (0, 0))


def fully_connected_forward(x, prepared: PreparedMLP, *, tm: int | None = None,
                            out_dtype=jnp.float32,
                            single_buffer_weights: bool = True):
    """Forward pass of FullyConnectedModel as a single fused Pallas kernel."""
    B, Din = x.shape
    assert Din == prepared.in_features, (Din, prepared.in_features)
    dpad = prepared.dpad
    n_layers = len(prepared.acts)

    # ---- batch-tile selection ------------------------------------------------
    tm_req = tm if tm is not None else _default_batch_tile()
    tm = min(_round_up(tm_req, 8), _round_up(B, 8))
    # Keep the widest f32 intermediate (tm x max(dpad) x 4B) within a sane
    # live-range budget so the compiler doesn't flip the kernel spill-bound.
    while tm > 8 and tm * max(dpad) * 4 > (8 << 20):
        tm //= 2
    tm = _round_up(max(tm, 8), 8)
    b_pad = _round_up(B, tm)

    # ---- input padding (skipped entirely when already aligned) ---------------
    if b_pad == B and dpad[0] == Din:
        x_p = x
    else:
        x_p = jnp.zeros((b_pad, dpad[0]), x.dtype).at[:B, :Din].set(x)

    # ---- explicit VMEM budget -------------------------------------------------
    def _vmem_limit(single_buffer: bool) -> int:
        wbuf = 1 if single_buffer else 2
        weight_bytes = sum(int(a.size) * a.dtype.itemsize
                           for a in prepared.flat_wb)
        io_bytes = (2 * tm * dpad[0] * np.dtype(x_p.dtype).itemsize     # x, dbl-buf
                    + 2 * tm * dpad[-1] * np.dtype(out_dtype).itemsize)  # out, dbl-buf
        inter_bytes = 2 * tm * max(dpad) * 4          # widest f32 intermediate + slack
        needed = wbuf * weight_bytes + io_bytes + inter_bytes
        # 25% headroom + 2 MiB, floored at 16 MiB, capped at v7x physical 64 MiB.
        return int(min(max(needed * 5 // 4 + (2 << 20), 16 << 20), 64 << 20))

    # ---- build + run the fused kernel -----------------------------------------
    def _call(single_buffer: bool):
        in_specs = [pl.BlockSpec((tm, dpad[0]), lambda i: (i, 0))]
        for l in range(n_layers):
            w_p = prepared.flat_wb[2 * l]
            b_p = prepared.flat_wb[2 * l + 1]
            in_specs.append(_resident_spec(w_p.shape, single_buffer))
            in_specs.append(_resident_spec(b_p.shape, single_buffer))

        kernel = functools.partial(_fused_mlp_kernel, acts=prepared.acts,
                                   compute_dtype=prepared.compute_dtype)
        return pl.pallas_call(
            kernel,
            out_shape=jax.ShapeDtypeStruct((b_pad, dpad[-1]), out_dtype),
            grid=(b_pad // tm,),
            in_specs=in_specs,
            out_specs=pl.BlockSpec((tm, dpad[-1]), lambda i: (i, 0)),
            compiler_params=pltpu.CompilerParams(
                # Batch tiles are independent -> pipelined x-tile DMA everywhere,
                # megacore split on v7x.
                dimension_semantics=("parallel",),
                vmem_limit_bytes=_vmem_limit(single_buffer),
            ),
        )(x_p, *prepared.flat_wb)

    if single_buffer_weights:
        try:
            out_p = _call(True)
        except Exception:
            # pl.Buffered(1) unsupported on this jax version: fall back to the
            # default 2-deep buffering (identical results, just more VMEM).
            out_p = _call(False)
    else:
        out_p = _call(False)

    # ---- output slice (skipped when already aligned) ---------------------------
    if b_pad == B and dpad[-1] == prepared.out_features:
        return out_p
    return out_p[:B, :prepared.out_features]


# --------------------------------------------------------------------------- #
# Init + pure-JAX reference (mirrors the PyTorch module)
# --------------------------------------------------------------------------- #
def init_fully_connected_params(key, input_dim, dims):
    """nn.Linear-style init: U(-1/sqrt(fan_in), 1/sqrt(fan_in)).

    PyTorch stores weight as (out, in); we keep (in, out) for y = x @ W.
    """
    params = []
    in_dim = input_dim
    for out_dim in dims:
        key, wk, bk = jax.random.split(key, 3)
        bound = 1.0 / math.sqrt(in_dim)
        w = jax.random.uniform(wk, (in_dim, out_dim), jnp.float32,
                               minval=-bound, maxval=bound)
        b = jax.random.uniform(bk, (1, out_dim), jnp.float32,
                               minval=-bound, maxval=bound)
        params.append((w, b))
        in_dim = out_dim
    return params


def _reference_forward(x, params, acts):
    h = x.astype(jnp.float32)
    for (w, b), act in zip(params, acts):
        h = _apply_act(h @ w + b, act)
    return h


# --------------------------------------------------------------------------- #
if __name__ == "__main__":
    # Small MNIST-autoencoder-ish config.
    batch = 8
    input_dim = 32
    dims = [64, 32, 16]
    acts = ["relu", "tanh", "linear"]

    key = jax.random.PRNGKey(0)
    key, xk = jax.random.split(key)
    x = jax.random.normal(xk, (batch, input_dim), dtype=jnp.float32)

    params = init_fully_connected_params(key, input_dim, dims)
    ref = _reference_forward(x, params, acts)

    # Default fast path: bf16 MXU inputs, f32 accumulation + f32 activation math.
    prepared_bf16 = prepare_fully_connected(params, input_dim, acts,
                                            compute_dtype=jnp.bfloat16)
    out = fully_connected_forward(x, prepared_bf16)
    out = jax.block_until_ready(out)
    assert out.shape == (batch, dims[-1]), out.shape
    assert out.dtype == jnp.float32, out.dtype
    assert jnp.allclose(out, ref, atol=5e-2, rtol=5e-2), \
        float(jnp.max(jnp.abs(out - ref)))

    # Exact path: f32 everywhere, matches the PyTorch `x.float()` reference.
    prepared_f32 = prepare_fully_connected(params, input_dim, acts,
                                           compute_dtype=jnp.float32)
    out32 = jax.block_until_ready(fully_connected_forward(x, prepared_f32))
    assert jnp.allclose(out32, ref, atol=1e-5, rtol=1e-5), \
        float(jnp.max(jnp.abs(out32 - ref)))

    print("KERNEL_OK")
</pallas_src>

<mosaic_0001>
module attributes {stable_mosaic.version = 11 : i64} {
  func.func @_fused_mlp_kernel(%arg0: i32, %arg1: memref<8x128xf32, #tpu.memory_space<vmem>>, %arg2: memref<128x128xbf16, #tpu.memory_space<vmem>>, %arg3: memref<1x128xf32, #tpu.memory_space<vmem>>, %arg4: memref<128x128xbf16, #tpu.memory_space<vmem>>, %arg5: memref<1x128xf32, #tpu.memory_space<vmem>>, %arg6: memref<128x128xbf16, #tpu.memory_space<vmem>>, %arg7: memref<1x128xf32, #tpu.memory_space<vmem>>, %arg8: memref<8x128xf32, #tpu.memory_space<vmem>>) attributes {dimension_semantics = [#tpu.dimension_semantics<parallel>], iteration_bounds = array<i64: 1>, scalar_prefetch = 0 : i64, scratch_operands = 0 : i64, tpu.core_type = #tpu.core_type<tc>, window_params = [{transform_indices = @transform_0, window_bounds = array<i64: 8, 128>}, {pipeline_mode = #tpu.pipeline_mode<synchronous>, transform_indices = @transform_1, window_bounds = array<i64: 128, 128>}, {pipeline_mode = #tpu.pipeline_mode<synchronous>, transform_indices = @transform_2, window_bounds = array<i64: 1, 128>}, {pipeline_mode = #tpu.pipeline_mode<synchronous>, transform_indices = @transform_3, window_bounds = array<i64: 128, 128>}, {pipeline_mode = #tpu.pipeline_mode<synchronous>, transform_indices = @transform_4, window_bounds = array<i64: 1, 128>}, {pipeline_mode = #tpu.pipeline_mode<synchronous>, transform_indices = @transform_5, window_bounds = array<i64: 128, 128>}, {pipeline_mode = #tpu.pipeline_mode<synchronous>, transform_indices = @transform_6, window_bounds = array<i64: 1, 128>}, {transform_indices = @transform_7, window_bounds = array<i64: 8, 128>}]} {
    %c0 = arith.constant 0 : index
    %c0_0 = arith.constant 0 : index
    %0 = vector.load %arg1[%c0, %c0_0] : memref<8x128xf32, #tpu.memory_space<vmem>>, vector<8x128xf32>
    %c0_1 = arith.constant 0 : index
    %c0_2 = arith.constant 0 : index
    %1 = vector.load %arg2[%c0_1, %c0_2] : memref<128x128xbf16, #tpu.memory_space<vmem>>, vector<128x128xbf16>
    %c0_3 = arith.constant 0 : index
    %c0_4 = arith.constant 0 : index
    %2 = vector.load %arg3[%c0_3, %c0_4] : memref<1x128xf32, #tpu.memory_space<vmem>>, vector<1x128xf32>
    %3 = arith.truncf %0 : vector<8x128xf32> to vector<8x128xbf16>
    %cst = arith.constant dense<0.000000e+00> : vector<8x128xf32>
    %4 = tpu.matmul %3, %1, %cst {dimension_numbers = #tpu.dot_dimension_numbers<[1], [0], [0], [1], [0, 0, 1, 1], [], []>} : vector<8x128xbf16>, vector<128x128xbf16>, vector<8x128xf32> -> vector<8x128xf32>
    %5 = vector.broadcast %2 : vector<1x128xf32> to vector<8x128xf32>
    %6 = arith.addf %4, %5 : vector<8x128xf32>
    %cst_5 = arith.constant 0.000000e+00 : f32
    %7 = vector.broadcast %cst_5 : f32 to vector<8x128xf32>
    %8 = arith.maximumf %6, %7 : vector<8x128xf32>
    %c0_6 = arith.constant 0 : index
    %c0_7 = arith.constant 0 : index
    %9 = vector.load %arg4[%c0_6, %c0_7] : memref<128x128xbf16, #tpu.memory_space<vmem>>, vector<128x128xbf16>
    %c0_8 = arith.constant 0 : index
    %c0_9 = arith.constant 0 : index
    %10 = vector.load %arg5[%c0_8, %c0_9] : memref<1x128xf32, #tpu.memory_space<vmem>>, vector<1x128xf32>
    %11 = arith.truncf %8 : vector<8x128xf32> to vector<8x128xbf16>
    %cst_10 = arith.constant dense<0.000000e+00> : vector<8x128xf32>
    %12 = tpu.matmul %11, %9, %cst_10 {dimension_numbers = #tpu.dot_dimension_numbers<[1], [0], [0], [1], [0, 0, 1, 1], [], []>} : vector<8x128xbf16>, vector<128x128xbf16>, vector<8x128xf32> -> vector<8x128xf32>
    %13 = vector.broadcast %10 : vector<1x128xf32> to vector<8x128xf32>
    %14 = arith.addf %12, %13 : vector<8x128xf32>
    %15 = math.tanh %14 : vector<8x128xf32>
    %c0_11 = arith.constant 0 : index
    %c0_12 = arith.constant 0 : index
    %16 = vector.load %arg6[%c0_11, %c0_12] : memref<128x128xbf16, #tpu.memory_space<vmem>>, vector<128x128xbf16>
    %c0_13 = arith.constant 0 : index
    %c0_14 = arith.constant 0 : index
    %17 = vector.load %arg7[%c0_13, %c0_14] : memref<1x128xf32, #tpu.memory_space<vmem>>, vector<1x128xf32>
    %18 = arith.truncf %15 : vector<8x128xf32> to vector<8x128xbf16>
    %cst_15 = arith.constant dense<0.000000e+00> : vector<8x128xf32>
    %19 = tpu.matmul %18, %16, %cst_15 {dimension_numbers = #tpu.dot_dimension_numbers<[1], [0], [0], [1], [0, 0, 1, 1], [], []>} : vector<8x128xbf16>, vector<128x128xbf16>, vector<8x128xf32> -> vector<8x128xf32>
    %20 = vector.broadcast %17 : vector<1x128xf32> to vector<8x128xf32>
    %21 = arith.addf %19, %20 : vector<8x128xf32>
    %c0_16 = arith.constant 0 : index
    %c0_17 = arith.constant 0 : index
    %22 = vector.load %arg8[%c0_16, %c0_17] : memref<8x128xf32, #tpu.memory_space<vmem>>, vector<8x128xf32>
    tpu.vector_store %arg8[%c0_16, %c0_17], %21 {strides = array<i32>} : memref<8x128xf32, #tpu.memory_space<vmem>>, vector<8x128xf32>,
    return
  }
  func.func @transform_0(%arg0: i32) -> (i32, i32) {
    %c0_i32 = arith.constant 0 : i32
    %c0_i32_0 = arith.constant 0 : i32
    return %arg0, %c0_i32 : i32, i32
  }
  func.func @transform_1(%arg0: i32) -> (i32, i32) {
    %c0_i32 = arith.constant 0 : i32
    %c0_i32_0 = arith.constant 0 : i32
    %c0_i32_1 = arith.constant 0 : i32
    return %c0_i32, %c0_i32_0 : i32, i32
  }
  func.func @transform_2(%arg0: i32) -> (i32, i32) {
    %c0_i32 = arith.constant 0 : i32
    %c0_i32_0 = arith.constant 0 : i32
    %c0_i32_1 = arith.constant 0 : i32
    return %c0_i32, %c0_i32_0 : i32, i32
  }
  func.func @transform_3(%arg0: i32) -> (i32, i32) {
    %c0_i32 = arith.constant 0 : i32
    %c0_i32_0 = arith.constant 0 : i32
    %c0_i32_1 = arith.constant 0 : i32
    return %c0_i32, %c0_i32_0 : i32, i32
  }
  func.func @transform_4(%arg0: i32) -> (i32, i32) {
    %c0_i32 = arith.constant 0 : i32
    %c0_i32_0 = arith.constant 0 : i32
    %c0_i32_1 = arith.constant 0 : i32
    return %c0_i32, %c0_i32_0 : i32, i32
  }
  func.func @transform_5(%arg0: i32) -> (i32, i32) {
    %c0_i32 = arith.constant 0 : i32
    %c0_i32_0 = arith.constant 0 : i32
    %c0_i32_1 = arith.constant 0 : i32
    return %c0_i32, %c0_i32_0 : i32, i32
  }
  func.func @transform_6(%arg0: i32) -> (i32, i32) {
    %c0_i32 = arith.constant 0 : i32
    %c0_i32_0 = arith.constant 0 : i32
    %c0_i32_1 = arith.constant 0 : i32
    return %c0_i32, %c0_i32_0 : i32, i32
  }
  func.func @transform_7(%arg0: i32) -> (i32, i32) {
    %c0_i32 = arith.constant 0 : i32
    %c0_i32_0 = arith.constant 0 : i32
    return %arg0, %c0_i32 : i32, i32
  }
}

module attributes {stable_mosaic.version = 11 : i64} {
  func.func @_fused_mlp_kernel(%arg0: i32, %arg1: memref<8x128xf32, #tpu.memory_space<vmem>>, %arg2: memref<128x128xbf16, #tpu.memory_space<vmem>>, %arg3: memref<1x128xf32, #tpu.memory_space<vmem>>, %arg4: memref<128x128xbf16, #tpu.memory_space<vmem>>, %arg5: memref<1x128xf32, #tpu.memory_space<vmem>>, %arg6: memref<128x128xbf16, #tpu.memory_space<vmem>>, %arg7: memref<1x128xf32, #tpu.memory_space<vmem>>, %arg8: memref<8x128xf32, #tpu.memory_space<vmem>>) attributes {dimension_semantics = [#tpu.dimension_semantics<parallel>], iteration_bounds = array<i64: 1>, scalar_prefetch = 0 : i64, scratch_operands = 0 : i64, tpu.core_type = #tpu.core_type<tc>, window_params = [{transform_indices = @transform_0, window_bounds = array<i64: 8, 128>}, {pipeline_mode = #tpu.pipeline_mode<synchronous>, transform_indices = @transform_1, window_bounds = array<i64: 128, 128>}, {pipeline_mode = #tpu.pipeline_mode<synchronous>, transform_indices = @transform_2, window_bounds = array<i64: 1, 128>}, {pipeline_mode = #tpu.pipeline_mode<synchronous>, transform_indices = @transform_3, window_bounds = array<i64: 128, 128>}, {pipeline_mode = #tpu.pipeline_mode<synchronous>, transform_indices = @transform_4, window_bounds = array<i64: 1, 128>}, {pipeline_mode = #tpu.pipeline_mode<synchronous>, transform_indices = @transform_5, window_bounds = array<i64: 128, 128>}, {pipeline_mode = #tpu.pipeline_mode<synchronous>, transform_indices = @transform_6, window_bounds = array<i64: 1, 128>}, {transform_indices = @transform_7, window_bounds = array<i64: 8, 128>}]} {
    %c0 = arith.constant 0 : index
    %c0_0 = arith.constant 0 : index
    %0 = vector.load %arg1[%c0, %c0_0] : memref<8x128xf32, #tpu.memory_space<vmem>>, vector<8x128xf32>
    %c0_1 = arith.constant 0 : index
    %c0_2 = arith.constant 0 : index
    %1 = vector.load %arg2[%c0_1, %c0_2] : memref<128x128xbf16, #tpu.memory_space<vmem>>, vector<128x128xbf16>
    %c0_3 = arith.constant 0 : index
    %c0_4 = arith.constant 0 : index
    %2 = vector.load %arg3[%c0_3, %c0_4] : memref<1x128xf32, #tpu.memory_space<vmem>>, vector<1x128xf32>
    %3 = arith.truncf %0 : vector<8x128xf32> to vector<8x128xbf16>
    %cst = arith.constant dense<0.000000e+00> : vector<8x128xf32>
    %4 = tpu.matmul %3, %1, %cst {dimension_numbers = #tpu.dot_dimension_numbers<[1], [0], [0], [1], [0, 0, 1, 1], [], []>} : vector<8x128xbf16>, vector<128x128xbf16>, vector<8x128xf32> -> vector<8x128xf32>
    %5 = vector.broadcast %2 : vector<1x128xf32> to vector<8x128xf32>
    %6 = arith.addf %4, %5 : vector<8x128xf32>
    %cst_5 = arith.constant 0.000000e+00 : f32
    %7 = vector.broadcast %cst_5 : f32 to vector<8x128xf32>
    %8 = arith.maximumf %6, %7 : vector<8x128xf32>
    %c0_6 = arith.constant 0 : index
    %c0_7 = arith.constant 0 : index
    %9 = vector.load %arg4[%c0_6, %c0_7] : memref<128x128xbf16, #tpu.memory_space<vmem>>, vector<128x128xbf16>
    %c0_8 = arith.constant 0 : index
    %c0_9 = arith.constant 0 : index
    %10 = vector.load %arg5[%c0_8, %c0_9] : memref<1x128xf32, #tpu.memory_space<vmem>>, vector<1x128xf32>
    %11 = arith.truncf %8 : vector<8x128xf32> to vector<8x128xbf16>
    %cst_10 = arith.constant dense<0.000000e+00> : vector<8x128xf32>
    %12 = tpu.matmul %11, %9, %cst_10 {dimension_numbers = #tpu.dot_dimension_numbers<[1], [0], [0], [1], [0, 0, 1, 1], [], []>} : vector<8x128xbf16>, vector<128x128xbf16>, vector<8x128xf32> -> vector<8x128xf32>
    %13 = vector.broadcast %10 : vector<1x128xf32> to vector<8x128xf32>
    %14 = arith.addf %12, %13 : vector<8x128xf32>
    %15 = math.tanh %14 : vector<8x128xf32>
    %c0_11 = arith.constant 0 : index
    %c0_12 = arith.constant 0 : index
    %16 = vector.load %arg6[%c0_11, %c0_12] : memref<128x128xbf16, #tpu.memory_space<vmem>>, vector<128x128xbf16>
    %c0_13 = arith.constant 0 : index
    %c0_14 = arith.constant 0 : index
    %17 = vector.load %arg7[%c0_13, %c0_14] : memref<1x128xf32, #tpu.memory_space<vmem>>, vector<1x128xf32>
    %18 = arith.truncf %15 : vector<8x128xf32> to vector<8x128xbf16>
    %cst_15 = arith.constant dense<0.000000e+00> : vector<8x128xf32>
    %19 = tpu.matmul %18, %16, %cst_15 {dimension_numbers = #tpu.dot_dimension_numbers<[1], [0], [0], [1], [0, 0, 1, 1], [], []>} : vector<8x128xbf16>, vector<128x128xbf16>, vector<8x128xf32> -> vector<8x128xf32>
    %20 = vector.broadcast %17 : vector<1x128xf32> to vector<8x128xf32>
    %21 = arith.addf %19, %20 : vector<8x128xf32>
    %c0_16 = arith.constant 0 : index
    %c0_17 = arith.constant 0 : index
    %22 = vector.load %arg8[%c0_16, %c0_17] : memref<8x128xf32, #tpu.memory_space<vmem>>, vector<8x128xf32>
    tpu.vector_store %arg8[%c0_16, %c0_17], %21 {strides = array<i32>} : memref<8x128xf32, #tpu.memory_space<vmem>>, vector<8x128xf32>,
    return
  }
  func.func @transform_0(%arg0: i32) -> (i32, i32) {
    %c0_i32 = arith.constant 0 : i32
    %c0_i32_0 = arith.constant 0 : i32
    return %arg0, %c0_i32 : i32, i32
  }
  func.func @transform_1(%arg0: i32) -> (i32, i32) {
    %c0_i32 = arith.constant 0 : i32
    %c0_i32_0 = arith.constant 0 : i32
    %c0_i32_1 = arith.constant 0 : i32
    return %c0_i32, %c0_i32_0 : i32, i32
  }
  func.func @transform_2(%arg0: i32) -> (i32, i32) {
    %c0_i32 = arith.constant 0 : i32
    %c0_i32_0 = arith.constant 0 : i32
    %c0_i32_1 = arith.constant 0 : i32
    return %c0_i32, %c0_i32_0 : i32, i32
  }
  func.func @transform_3(%arg0: i32) -> (i32, i32) {
    %c0_i32 = arith.constant 0 : i32
    %c0_i32_0 = arith.constant 0 : i32
    %c0_i32_1 = arith.constant 0 : i32
    return %c0_i32, %c0_i32_0 : i32, i32
  }
  func.func @transform_4(%arg0: i32) -> (i32, i32) {
    %c0_i32 = arith.constant 0 : i32
    %c0_i32_0 = arith.constant 0 : i32
    %c0_i32_1 = arith.constant 0 : i32
    return %c0_i32, %c0_i32_0 : i32, i32
  }
  func.func @transform_5(%arg0: i32) -> (i32, i32) {
    %c0_i32 = arith.constant 0 : i32
    %c0_i32_0 = arith.constant 0 : i32
    %c0_i32_1 = arith.constant 0 : i32
    return %c0_i32, %c0_i32_0 : i32, i32
  }
  func.func @transform_6(%arg0: i32) -> (i32, i32) {
    %c0_i32 = arith.constant 0 : i32
    %c0_i32_0 = arith.constant 0 : i32
    %c0_i32_1 = arith.constant 0 : i32
    return %c0_i32, %c0_i32_0 : i32, i32
  }
  func.func @transform_7(%arg0: i32) -> (i32, i32) {
    %c0_i32 = arith.constant 0 : i32
    %c0_i32_0 = arith.constant 0 : i32
    return %arg0, %c0_i32 : i32, i32
  }
}

</mosaic_0001>

<bundles_post_ra>
// kernel: tpu_custom_call.1
= control target key start
LH: loop header
LB: loop body
LE: loop exit
PB: predicated region body
PF: predicated region fallthrough
CT: control target
= control target key end

     0   :  { %12 = vsyncpa [#allocation3], 0  ;;  %s862_s0 = inlined_call_operand.hbm [shape: f32[8,128], index: 0, kind: input, shape index: {}]   ;;  %s863_s1 = inlined_call_operand.hbm [shape: bf16[128,128], index: 1, kind: input, shape index: {}]   ;;  %s864_s2 = inlined_call_operand.vmem [shape: f32[1,128], index: 2, kind: input, shape index: {}]   ;;  %s865_s3 = inlined_call_operand.hbm [shape: bf16[128,128], index: 3, kind: input, shape index: {}]   ;;  %s866_s4 = inlined_call_operand.vmem [shape: f32[1,128], index: 4, kind: input, shape index: {}]   ;;  %s867_s5 = inlined_call_operand.hbm [shape: bf16[128,128], index: 5, kind: input, shape index: {}]   ;;  %s868_s6 = inlined_call_operand.vmem [shape: f32[1,128], index: 6, kind: input, shape index: {}]   ;;  %s869_s7 = inlined_call_operand.hbm [shape: f32[8,128], index: 7, kind: output, shape index: {}]  }
   0x1   :  { %13 = vsyncpa [#allocation6], 0 }
   0x2   :  { %14 = vsyncpa [#allocation9], 0 }
   0x3   :  { %15 = vsyncpa [#allocation4], 0  ;;  %s705_s24 = smov [#allocation5]   ;;  %s587_s28 = scalar_lea.hbm %s863_s1, 1024 }
   0x4   :  { %s31_s25 = sshll.u32 %s705_s24, 4  ;;  %p588_p0 = scmp.ne.s32.totalorder %s863_s1, %s587_s28  ;;  %s32_s25 = int_to_ptr.vmem [resolvable:$true] %s31_s25 }
   0x5   :  { %p591_p1 = scmp.lt.u32.totalorder %s587_s28, %s863_s1 }
   0x7   :  { %p593_p2 = pnand %p591_p1, %p588_p0 }
   0x9   :  { %596 = shalt.err (!%p593_p2)
}
   0xa   :  { %s597_s10 = scalar_lea.vmem %s32_s25, 1024  ;;  %p602_p4 = scmp.lt.s32.totalorder %s32_s25, %s32_s25 }
   0xb   :  { %p598_p3 = scmp.ne.s32.totalorder %s32_s25, %s597_s10  ;;  %p603_p5 = scmp.lt.s32.totalorder %s597_s10, %s597_s10 }
   0xd   :  { %p604_p6 = por %p603_p5, %p602_p4 }
   0xf   :  { %p605_p7 = pnand %p604_p6, %p598_p3 }
  0x11   :  { %608 = shalt.err (!%p605_p7)
}
  0x12   :  { %s706_s11 = smov 64   ;;  %s707_s12 = smov 4  }
  0x13   :  { %37 = dma.hbm_to_vmem [thread:$0]  %s863_s1, 1024, %s32_s25, [#allocation6], %s706_s11, %s706_s11, %s707_s12  }
  0x14   :  { %s708_s15 = smov [#allocation2]   ;;  %s709_s17 = smov [#allocation7]  }
  0x15   :  { %s22_s16 = sshll.u32 %s708_s15, 4  ;;  %s45_s18 = sshll.u32 %s709_s17, 4  ;;  %s23_s16 = int_to_ptr.vmem [resolvable:$true] %s22_s16  ;;  %s46_s18 = int_to_ptr.vmem [resolvable:$true] %s45_s18 }
  0x16   :  { %s609_s21 = scalar_lea.hbm %s862_s0, 128 }
  0x17   :  { %p610_p8 = scmp.ne.s32.totalorder %s862_s0, %s609_s21  ;;  %p613_p9 = scmp.lt.u32.totalorder %s609_s21, %s862_s0 }
  0x19   :  { %p615_p10 = pnand %p613_p9, %p610_p8 }
  0x1b   :  { %618 = shalt.err (!%p615_p10)
}
  0x1c   :  { %s619_s1 = scalar_lea.vmem %s23_s16, 128  ;;  %p624_p12 = scmp.lt.s32.totalorder %s23_s16, %s23_s16 }
  0x1d   :  { %p620_p11 = scmp.ne.s32.totalorder %s23_s16, %s619_s1  ;;  %p625_p13 = scmp.lt.s32.totalorder %s619_s1, %s619_s1 }
  0x1f   :  { %p626_p0 = por %p625_p13, %p624_p12 }
  0x21   :  { %p627_p1 = pnand %p626_p0, %p620_p11 }
  0x23   :  { %630 = shalt.err (!%p627_p1)
}
  0x24   :  { %25 = dma.hbm_to_vmem [thread:$0]  %s862_s0, 128, %s23_s16, [#allocation3]  }
  0x25   :  { %s631_s30 = scalar_lea.hbm %s865_s3, 1024 }
  0x26   :  { %p632_p2 = scmp.ne.s32.totalorder %s865_s3, %s631_s30  ;;  %p635_p3 = scmp.lt.u32.totalorder %s631_s30, %s865_s3 }
  0x28   :  { %p637_p4 = pnand %p635_p3, %p632_p2 }
  0x2a   :  { %640 = shalt.err (!%p637_p4)
}
  0x2b   :  { %s641_s14 = scalar_lea.vmem %s46_s18, 1024  ;;  %p646_p6 = scmp.lt.s32.totalorder %s46_s18, %s46_s18 }
  0x2c   :  { %p642_p5 = scmp.ne.s32.totalorder %s46_s18, %s641_s14  ;;  %p647_p7 = scmp.lt.s32.totalorder %s641_s14, %s641_s14 }
  0x2e   :  { %p648_p8 = por %p647_p7, %p646_p6 }
  0x30   :  { %p649_p9 = pnand %p648_p8, %p642_p5 }
  0x32   :  { %652 = shalt.err (!%p649_p9)
}
  0x33   :  { %51 = dma.hbm_to_vmem [thread:$0]  %s865_s3, 1024, %s46_s18, [#allocation6], %s706_s11, %s706_s11, %s707_s12  }
  0x34   :  { %s710_s16 = smov [#allocation8]   ;;  %s653_s21 = scalar_lea.hbm %s867_s5, 1024 }
  0x35   :  { %s59_s17 = sshll.u32 %s710_s16, 4  ;;  %p654_p10 = scmp.ne.s32.totalorder %s867_s5, %s653_s21  ;;  %s60_s17 = int_to_ptr.vmem [resolvable:$true] %s59_s17 }
  0x36   :  { %p657_p11 = scmp.lt.u32.totalorder %s653_s21, %s867_s5 }
  0x38   :  { %p659_p12 = pnand %p657_p11, %p654_p10 }
  0x3a   :  { %662 = shalt.err (!%p659_p12)
}
  0x3b   :  { %s663_s1 = scalar_lea.vmem %s60_s17, 1024  ;;  %p668_p0 = scmp.lt.s32.totalorder %s60_s17, %s60_s17 }
  0x3c   :  { %p664_p13 = scmp.ne.s32.totalorder %s60_s17, %s663_s1  ;;  %p669_p1 = scmp.lt.s32.totalorder %s663_s1, %s663_s1 }
  0x3e   :  { %p670_p2 = por %p669_p1, %p668_p0 }
  0x40   :  { %p671_p3 = pnand %p670_p2, %p664_p13 }
  0x42   :  { %674 = shalt.err (!%p671_p3)
}
  0x43   :  { %65 = dma.hbm_to_vmem [thread:$0]  %s867_s5, 1024, %s60_s17, [#allocation9], %s706_s11, %s706_s11, %s707_s12  }
  0x44   :  { %697 = dma.done.wait [#allocation3], 128  }
  0x45   :  { %698 = vsyncadd [#allocation3], 4294967168 }
  0x46   :  { %699 = dma.done.wait [#allocation6], 2048  }
  0x47   :  { %700 = vsyncadd [#allocation6], 4294965248 }
  0x48   :  { %701 = dma.done.wait [#allocation9], 1024  }
  0x49   :  { %702 = vsyncadd [#allocation9], 4294966272  ;;  %v711_v0 = vmov 0.0   ;;  %vm712_vm0 = vmmov 0   ;;  %v561_v1 = vld [vmem:[#allocation5] sm:$0xff]   ;;  %v562_v2 = vld [vmem:[#allocation5 + $0x8] sm:$0xff]  }
  0x4a   :  { %492 = vmatprep.subr.bf16.mxu0 %v711_v0  ;;  %508 = vmatprep.mubr.msk.bf16.mxu0 %vm712_vm0, %v711_v0  ;;  %v563_v3 = vld [vmem:[#allocation5 + $0x10] sm:$0xff]   ;;  %v569_v4 = vld [vmem:[#allocation7] sm:$0xff]   ;;  %v564_v5 = vld [vmem:[#allocation5 + $0x18] sm:$0xff]   ;;  %s713_s28 = smov [#allocation10]  }
  0x4b   :  { %512 = vmatprep.subr.bf16.mxu1 %v711_v0  ;;  %528 = vmatprep.mubr.msk.bf16.mxu1 %vm712_vm0, %v711_v0  ;;  %v570_v6 = vld [vmem:[#allocation7 + $0x8] sm:$0xff]   ;;  %v565_v7 = vld [vmem:[#allocation5 + $0x20] sm:$0xff]   ;;  %v571_v8 = vld [vmem:[#allocation7 + $0x10] sm:$0xff]   ;;  %s427_s29 = sshll.u32 %s713_s28, 4  ;;  %s428_s29 = int_to_ptr.vmem [resolvable:$true] %s427_s29 }
  0x4c   :  { %493 = vmatpush3.bf16.msra.mxu0 %v561_v1  ;;  %513 = vmatpush3.bf16.msra.mxu1 %v569_v4  ;;  %v566_v9 = vld [vmem:[#allocation5 + $0x28] sm:$0xff]   ;;  %v572_v10 = vld [vmem:[#allocation7 + $0x18] sm:$0xff]   ;;  %v567_v11 = vld [vmem:[#allocation5 + $0x30] sm:$0xff]   ;;  %p680_p5 = scmp.lt.s32.totalorder %s428_s29, %s428_s29 }
  0x4d   :  { %494 = vmatprep.subr.bf16.mxu0 %v711_v0  ;;  %514 = vmatprep.subr.bf16.mxu1 %v711_v0  ;;  %v573_v12 = vld [vmem:[#allocation7 + $0x20] sm:$0xff]   ;;  %v568_v13 = vld [vmem:[#allocation5 + $0x38] sm:$0xff]   ;;  %v574_v15 = vld [vmem:[#allocation7 + $0x28] sm:$0xff]  }
  0x4e   :  { %v81_v14 = vld [vmem:[#allocation2] sm:$0xff]  ;;  %v575_v17 = vld [vmem:[#allocation7 + $0x30] sm:$0xff]   ;;  %v577_v19 = vld [vmem:[#allocation8] sm:$0xff]  }
  0x4f   :  { %v99_v16 = vpack.c.bf16 %v81_v14, %v81_v14  ;;  %v576_v18 = vld [vmem:[#allocation7 + $0x38] sm:$0xff]   ;;  %v578_v20 = vld [vmem:[#allocation8 + $0x8] sm:$0xff]   ;;  %v579_v21 = vld [vmem:[#allocation8 + $0x10] sm:$0xff]  }
  0x50   :  { %495 = vmatpush3.bf16.msra.mxu0 %v562_v2  ;;  %515 = vmatpush3.bf16.msra.mxu1 %v570_v6  ;;  %v580_v22 = vld [vmem:[#allocation8 + $0x18] sm:$0xff]   ;;  %v581_v31 = vld [vmem:[#allocation8 + $0x20] sm:$0xff]   ;;  %v582_v32 = vld [vmem:[#allocation8 + $0x28] sm:$0xff]  }
  0x51   :  { %496 = vmatprep.subr.bf16.mxu0 %v711_v0  ;;  %516 = vmatprep.subr.bf16.mxu1 %v711_v0  ;;  %v438_v23 = vld [vmem:[%s864_s2] ss:$0 sm:$0xff]  ;;  %v583_v33 = vld [vmem:[#allocation8 + $0x30] sm:$0xff]  }
  0x52   :  { %v584_v34 = vld [vmem:[#allocation8 + $0x38] sm:$0xff]  }
  0x53   :  { %v447_v35 = vld [vmem:[%s866_s4] ss:$0 sm:$0xff]  ;;  %s675_s4 = scalar_lea.vmem %s428_s29, 128 }
  0x54   :  { %497 = vmatpush3.bf16.msra.mxu0 %v563_v3  ;;  %517 = vmatpush3.bf16.msra.mxu1 %v571_v8  ;;  %v456_v43 = vld [vmem:[%s868_s6] ss:$0 sm:$0xff]  ;;  %p676_p4 = scmp.ne.s32.totalorder %s428_s29, %s675_s4  ;;  %p681_p6 = scmp.lt.s32.totalorder %s675_s4, %s675_s4 }
  0x55   :  { %498 = vmatprep.subr.bf16.mxu0 %v711_v0  ;;  %518 = vmatprep.subr.bf16.mxu1 %v711_v0 }
  0x56   :  { %p682_p7 = por %p681_p6, %p680_p5 }
  0x58   :  { %499 = vmatpush3.bf16.msra.mxu0 %v564_v5  ;;  %519 = vmatpush3.bf16.msra.mxu1 %v572_v10  ;;  %p683_p8 = pnand %p682_p7, %p676_p4 }
  0x59   :  { %500 = vmatprep.subr.bf16.mxu0 %v711_v0  ;;  %520 = vmatprep.subr.bf16.mxu1 %v711_v0 }
  0x5c   :  { %501 = vmatpush3.bf16.msra.mxu0 %v565_v7  ;;  %521 = vmatpush3.bf16.msra.mxu1 %v573_v12 }
  0x5d   :  { %502 = vmatprep.subr.bf16.mxu0 %v711_v0  ;;  %522 = vmatprep.subr.bf16.mxu1 %v711_v0 }
  0x60   :  { %503 = vmatpush3.bf16.msra.mxu0 %v566_v9  ;;  %523 = vmatpush3.bf16.msra.mxu1 %v574_v15 }
  0x61   :  { %504 = vmatprep.subr.bf16.mxu0 %v711_v0  ;;  %524 = vmatprep.subr.bf16.mxu1 %v711_v0 }
  0x64   :  { %505 = vmatpush3.bf16.msra.mxu0 %v567_v11  ;;  %525 = vmatpush3.bf16.msra.mxu1 %v575_v17 }
  0x65   :  { %506 = vmatprep.subr.bf16.mxu0 %v711_v0  ;;  %526 = vmatprep.subr.bf16.mxu1 %v711_v0 }
  0x68   :  { %507 = vmatpush3.bf16.msra.mxu0 %v568_v13  ;;  %527 = vmatpush3.bf16.msra.mxu1 %v576_v18 }
  0x69   :  { %532 = vmatprep.subr.bf16.mxu0 %v711_v0 }
  0x6b   :  { %509 = vmatmul.mubr.bf16.vlgmr.msra.gmra.mrb[0].mxu0 %v99_v16 }
  0x6c   :  { %548 = vmatprep.mubr.msk.bf16.mxu0 %vm712_vm0, %v711_v0  ;;  %533 = vmatpush3.bf16.msra.mxu0 %v577_v19 }
  0x6d   :  { %534 = vmatprep.subr.bf16.mxu0 %v711_v0 }
  0x70   :  { %535 = vmatpush3.bf16.msra.mxu0 %v578_v20 }
  0x71   :  { %536 = vmatprep.subr.bf16.mxu0 %v711_v0 }
  0x74   :  { %537 = vmatpush3.bf16.msra.mxu0 %v579_v21 }
  0x75   :  { %538 = vmatprep.subr.bf16.mxu0 %v711_v0 }
  0x78   :  { %539 = vmatpush3.bf16.msra.mxu0 %v580_v22 }
  0x79   :  { %540 = vmatprep.subr.bf16.mxu0 %v711_v0 }
  0x7c   :  { %541 = vmatpush3.bf16.msra.mxu0 %v581_v31 }
  0x7d   :  { %542 = vmatprep.subr.bf16.mxu0 %v711_v0 }
  0x80   :  { %543 = vmatpush3.bf16.msra.mxu0 %v582_v32 }
  0x81   :  { %544 = vmatprep.subr.bf16.mxu0 %v711_v0 }
  0x84   :  { %545 = vmatpush3.bf16.msra.mxu0 %v583_v33 }
  0x85   :  { %546 = vmatprep.subr.bf16.mxu0 %v711_v0 }
  0x88   :  { %547 = vmatpush3.bf16.msra.mxu0 %v584_v34 }
 0x13e   :  { %v188_v24 = vpop.f32.mrb[0].mxu0 }
 0x13f   :  { %v189_v25 = vadd.f32 %v438_v23, %v188_v24  ;;  %v510_v26 = vpop.f32.mrb[1].mxu0 }
 0x140   :  { %v191_v27 = vpop.f32.mrb[2].mxu0 }
 0x141   :  { %v194_v28 = vmax.f32 %v189_v25, 0.0  ;;  %v511_v29 = vpop.f32.mrb[3].mxu0 }
 0x143   :  { %v212_v30 = vpack.c.bf16 %v194_v28, %v194_v28 }
 0x145   :  { %529 = vmatmul.mubr.bf16.vlgmr.msra.gmra.mrb[0].mxu1 %v212_v30 }
 0x218   :  { %v301_v36 = vpop.f32.mrb[0].mxu1 }
 0x219   :  { %v302_v37 = vadd.f32 %v447_v35, %v301_v36  ;;  %v530_v38 = vpop.f32.mrb[1].mxu1 }
 0x21a   :  { %v304_v39 = vpop.f32.mrb[2].mxu1 }
 0x21b   :  { %585 = vtanh.f32 %v302_v37  ;;  %v531_v40 = vpop.f32.mrb[3].mxu1 }
 0x225   :  { %v586_v41 = vpop.eup %585 }
 0x226   :  { %v325_v42 = vpack.c.bf16 %v586_v41, %v586_v41 }
 0x228   :  { %549 = vmatmul.mubr.bf16.vlgmr.msra.gmra.mrb[4].mxu0 %v325_v42 }
 0x2fb   :  { %v414_v44 = vpop.f32.mrb[4].mxu0 }
 0x2fc   :  { %v415_v45 = vadd.f32 %v456_v43, %v414_v44  ;;  %v550_v46 = vpop.f32.mrb[5].mxu0 }
 0x2fd   :  { %v417_v47 = vpop.f32.mrb[6].mxu0 }
 0x2fe   :  { %420 = vst [vmem:[#allocation10] sm:$0xff] %v415_v45  ;;  %v551_v48 = vpop.f32.mrb[7].mxu0 }
 0x2ff   :  { %686 = shalt.err (!%p683_p8)
}
 0x300   :  { %s687_s6 = scalar_lea.hbm %s869_s7, 128 }
 0x301   :  { %p688_p9 = scmp.ne.s32.totalorder %s869_s7, %s687_s6  ;;  %p691_p10 = scmp.lt.u32.totalorder %s687_s6, %s869_s7 }
 0x303   :  { %p693_p11 = pnand %p691_p10, %p688_p9 }
 0x305   :  { %696 = shalt.err (!%p693_p11)
}
 0x306   :  { %430 = dma.vmem_to_hbm [thread:$0]  %s428_s29, 128, %s869_s7, [#allocation4]  }
 0x307   :  { %703 = dma.done.wait [#allocation4], 128  }
 0x308   :  { %704 = vsyncadd [#allocation4], 4294967168 }
 0x309   :  { %434 = vsyncpa [#allocation3], 1 }
 0x30a   :  { %435 = vsyncpa [#allocation6], 1 }
 0x30b   :  { %436 = vsyncpa [#allocation9], 1 }
 0x30c   :  { %437 = vsyncpa [#allocation4], 1 }

// kernel: tpu_custom_call.1
= control target key start
LH: loop header
LB: loop body
LE: loop exit
PB: predicated region body
PF: predicated region fallthrough
CT: control target
= control target key end

     0   :  { %12 = vsyncpa [#allocation3], 0  ;;  %s862_s0 = inlined_call_operand.hbm [shape: f32[8,128], index: 0, kind: input, shape index: {}]   ;;  %s863_s1 = inlined_call_operand.hbm [shape: bf16[128,128], index: 1, kind: input, shape index: {}]   ;;  %s864_s2 = inlined_call_operand.vmem [shape: f32[1,128], index: 2, kind: input, shape index: {}]   ;;  %s865_s3 = inlined_call_operand.hbm [shape: bf16[128,128], index: 3, kind: input, shape index: {}]   ;;  %s866_s4 = inlined_call_operand.vmem [shape: f32[1,128], index: 4, kind: input, shape index: {}]   ;;  %s867_s5 = inlined_call_operand.hbm [shape: bf16[128,128], index: 5, kind: input, shape index: {}]   ;;  %s868_s6 = inlined_call_operand.vmem [shape: f32[1,128], index: 6, kind: input, shape index: {}]   ;;  %s869_s7 = inlined_call_operand.hbm [shape: f32[8,128], index: 7, kind: output, shape index: {}]  }
   0x1   :  { %13 = vsyncpa [#allocation6], 0 }
   0x2   :  { %14 = vsyncpa [#allocation9], 0 }
   0x3   :  { %15 = vsyncpa [#allocation4], 0  ;;  %s705_s24 = smov [#allocation5]   ;;  %s587_s28 = scalar_lea.hbm %s863_s1, 1024 }
   0x4   :  { %s31_s25 = sshll.u32 %s705_s24, 4  ;;  %p588_p0 = scmp.ne.s32.totalorder %s863_s1, %s587_s28  ;;  %s32_s25 = int_to_ptr.vmem [resolvable:$true] %s31_s25 }
   0x5   :  { %p591_p1 = scmp.lt.u32.totalorder %s587_s28, %s863_s1 }
   0x7   :  { %p593_p2 = pnand %p591_p1, %p588_p0 }
   0x9   :  { %596 = shalt.err (!%p593_p2)
}
   0xa   :  { %s597_s10 = scalar_lea.vmem %s32_s25, 1024  ;;  %p602_p4 = scmp.lt.s32.totalorder %s32_s25, %s32_s25 }
   0xb   :  { %p598_p3 = scmp.ne.s32.totalorder %s32_s25, %s597_s10  ;;  %p603_p5 = scmp.lt.s32.totalorder %s597_s10, %s597_s10 }
   0xd   :  { %p604_p6 = por %p603_p5, %p602_p4 }
   0xf   :  { %p605_p7 = pnand %p604_p6, %p598_p3 }
  0x11   :  { %608 = shalt.err (!%p605_p7)
}
  0x12   :  { %s706_s11 = smov 64   ;;  %s707_s12 = smov 4  }
  0x13   :  { %37 = dma.hbm_to_vmem [thread:$0]  %s863_s1, 1024, %s32_s25, [#allocation6], %s706_s11, %s706_s11, %s707_s12  }
  0x14   :  { %s708_s15 = smov [#allocation2]   ;;  %s709_s17 = smov [#allocation7]  }
  0x15   :  { %s22_s16 = sshll.u32 %s708_s15, 4  ;;  %s45_s18 = sshll.u32 %s709_s17, 4  ;;  %s23_s16 = int_to_ptr.vmem [resolvable:$true] %s22_s16  ;;  %s46_s18 = int_to_ptr.vmem [resolvable:$true] %s45_s18 }
  0x16   :  { %s609_s21 = scalar_lea.hbm %s862_s0, 128 }
  0x17   :  { %p610_p8 = scmp.ne.s32.totalorder %s862_s0, %s609_s21  ;;  %p613_p9 = scmp.lt.u32.totalorder %s609_s21, %s862_s0 }
  0x19   :  { %p615_p10 = pnand %p613_p9, %p610_p8 }
  0x1b   :  { %618 = shalt.err (!%p615_p10)
}
  0x1c   :  { %s619_s1 = scalar_lea.vmem %s23_s16, 128  ;;  %p624_p12 = scmp.lt.s32.totalorder %s23_s16, %s23_s16 }
  0x1d   :  { %p620_p11 = scmp.ne.s32.totalorder %s23_s16, %s619_s1  ;;  %p625_p13 = scmp.lt.s32.totalorder %s619_s1, %s619_s1 }
  0x1f   :  { %p626_p0 = por %p625_p13, %p624_p12 }
  0x21   :  { %p627_p1 = pnand %p626_p0, %p620_p11 }
  0x23   :  { %630 = shalt.err (!%p627_p1)
}
  0x24   :  { %25 = dma.hbm_to_vmem [thread:$0]  %s862_s0, 128, %s23_s16, [#allocation3]  }
  0x25   :  { %s631_s30 = scalar_lea.hbm %s865_s3, 1024 }
  0x26   :  { %p632_p2 = scmp.ne.s32.totalorder %s865_s3, %s631_s30  ;;  %p635_p3 = scmp.lt.u32.totalorder %s631_s30, %s865_s3 }
  0x28   :  { %p637_p4 = pnand %p635_p3, %p632_p2 }
  0x2a   :  { %640 = shalt.err (!%p637_p4)
}
  0x2b   :  { %s641_s14 = scalar_lea.vmem %s46_s18, 1024  ;;  %p646_p6 = scmp.lt.s32.totalorder %s46_s18, %s46_s18 }
  0x2c   :  { %p642_p5 = scmp.ne.s32.totalorder %s46_s18, %s641_s14  ;;  %p647_p7 = scmp.lt.s32.totalorder %s641_s14, %s641_s14 }
  0x2e   :  { %p648_p8 = por %p647_p7, %p646_p6 }
  0x30   :  { %p649_p9 = pnand %p648_p8, %p642_p5 }
  0x32   :  { %652 = shalt.err (!%p649_p9)
}
  0x33   :  { %51 = dma.hbm_to_vmem [thread:$0]  %s865_s3, 1024, %s46_s18, [#allocation6], %s706_s11, %s706_s11, %s707_s12  }
  0x34   :  { %s710_s16 = smov [#allocation8]   ;;  %s653_s21 = scalar_lea.hbm %s867_s5, 1024 }
  0x35   :  { %s59_s17 = sshll.u32 %s710_s16, 4  ;;  %p654_p10 = scmp.ne.s32.totalorder %s867_s5, %s653_s21  ;;  %s60_s17 = int_to_ptr.vmem [resolvable:$true] %s59_s17 }
  0x36   :  { %p657_p11 = scmp.lt.u32.totalorder %s653_s21, %s867_s5 }
  0x38   :  { %p659_p12 = pnand %p657_p11, %p654_p10 }
  0x3a   :  { %662 = shalt.err (!%p659_p12)
}
  0x3b   :  { %s663_s1 = scalar_lea.vmem %s60_s17, 1024  ;;  %p668_p0 = scmp.lt.s32.totalorder %s60_s17, %s60_s17 }
  0x3c   :  { %p664_p13 = scmp.ne.s32.totalorder %s60_s17, %s663_s1  ;;  %p669_p1 = scmp.lt.s32.totalorder %s663_s1, %s663_s1 }
  0x3e   :  { %p670_p2 = por %p669_p1, %p668_p0 }
  0x40   :  { %p671_p3 = pnand %p670_p2, %p664_p13 }
  0x42   :  { %674 = shalt.err (!%p671_p3)
}
  0x43   :  { %65 = dma.hbm_to_vmem [thread:$0]  %s867_s5, 1024, %s60_s17, [#allocation9], %s706_s11, %s706_s11, %s707_s12  }
  0x44   :  { %697 = dma.done.wait [#allocation3], 128  }
  0x45   :  { %698 = vsyncadd [#allocation3], 4294967168 }
  0x46   :  { %699 = dma.done.wait [#allocation6], 2048  }
  0x47   :  { %700 = vsyncadd [#allocation6], 4294965248 }
  0x48   :  { %701 = dma.done.wait [#allocation9], 1024  }
  0x49   :  { %702 = vsyncadd [#allocation9], 4294966272  ;;  %v711_v0 = vmov 0.0   ;;  %vm712_vm0 = vmmov 0   ;;  %v561_v1 = vld [vmem:[#allocation5] sm:$0xff]   ;;  %v562_v2 = vld [vmem:[#allocation5 + $0x8] sm:$0xff]  }
  0x4a   :  { %492 = vmatprep.subr.bf16.mxu0 %v711_v0  ;;  %508 = vmatprep.mubr.msk.bf16.mxu0 %vm712_vm0, %v711_v0  ;;  %v563_v3 = vld [vmem:[#allocation5 + $0x10] sm:$0xff]   ;;  %v569_v4 = vld [vmem:[#allocation7] sm:$0xff]   ;;  %v564_v5 = vld [vmem:[#allocation5 + $0x18] sm:$0xff]   ;;  %s713_s28 = smov [#allocation10]  }
  0x4b   :  { %512 = vmatprep.subr.bf16.mxu1 %v711_v0  ;;  %528 = vmatprep.mubr.msk.bf16.mxu1 %vm712_vm0, %v711_v0  ;;  %v570_v6 = vld [vmem:[#allocation7 + $0x8] sm:$0xff]   ;;  %v565_v7 = vld [vmem:[#allocation5 + $0x20] sm:$0xff]   ;;  %v571_v8 = vld [vmem:[#allocation7 + $0x10] sm:$0xff]   ;;  %s427_s29 = sshll.u32 %s713_s28, 4  ;;  %s428_s29 = int_to_ptr.vmem [resolvable:$true] %s427_s29 }
  0x4c   :  { %493 = vmatpush3.bf16.msra.mxu0 %v561_v1  ;;  %513 = vmatpush3.bf16.msra.mxu1 %v569_v4  ;;  %v566_v9 = vld [vmem:[#allocation5 + $0x28] sm:$0xff]   ;;  %v572_v10 = vld [vmem:[#allocation7 + $0x18] sm:$0xff]   ;;  %v567_v11 = vld [vmem:[#allocation5 + $0x30] sm:$0xff]   ;;  %p680_p5 = scmp.lt.s32.totalorder %s428_s29, %s428_s29 }
  0x4d   :  { %494 = vmatprep.subr.bf16.mxu0 %v711_v0  ;;  %514 = vmatprep.subr.bf16.mxu1 %v711_v0  ;;  %v573_v12 = vld [vmem:[#allocation7 + $0x20] sm:$0xff]   ;;  %v568_v13 = vld [vmem:[#allocation5 + $0x38] sm:$0xff]   ;;  %v574_v15 = vld [vmem:[#allocation7 + $0x28] sm:$0xff]  }
  0x4e   :  { %v81_v14 = vld [vmem:[#allocation2] sm:$0xff]  ;;  %v575_v17 = vld [vmem:[#allocation7 + $0x30] sm:$0xff]   ;;  %v577_v19 = vld [vmem:[#allocation8] sm:$0xff]  }
  0x4f   :  { %v99_v16 = vpack.c.bf16 %v81_v14, %v81_v14  ;;  %v576_v18 = vld [vmem:[#allocation7 + $0x38] sm:$0xff]   ;;  %v578_v20 = vld [vmem:[#allocation8 + $0x8] sm:$0xff]   ;;  %v579_v21 = vld [vmem:[#allocation8 + $0x10] sm:$0xff]  }
  0x50   :  { %495 = vmatpush3.bf16.msra.mxu0 %v562_v2  ;;  %515 = vmatpush3.bf16.msra.mxu1 %v570_v6  ;;  %v580_v22 = vld [vmem:[#allocation8 + $0x18] sm:$0xff]   ;;  %v581_v31 = vld [vmem:[#allocation8 + $0x20] sm:$0xff]   ;;  %v582_v32 = vld [vmem:[#allocation8 + $0x28] sm:$0xff]  }
  0x51   :  { %496 = vmatprep.subr.bf16.mxu0 %v711_v0  ;;  %516 = vmatprep.subr.bf16.mxu1 %v711_v0  ;;  %v438_v23 = vld [vmem:[%s864_s2] ss:$0 sm:$0xff]  ;;  %v583_v33 = vld [vmem:[#allocation8 + $0x30] sm:$0xff]  }
  0x52   :  { %v584_v34 = vld [vmem:[#allocation8 + $0x38] sm:$0xff]  }
  0x53   :  { %v447_v35 = vld [vmem:[%s866_s4] ss:$0 sm:$0xff]  ;;  %s675_s4 = scalar_lea.vmem %s428_s29, 128 }
  0x54   :  { %497 = vmatpush3.bf16.msra.mxu0 %v563_v3  ;;  %517 = vmatpush3.bf16.msra.mxu1 %v571_v8  ;;  %v456_v43 = vld [vmem:[%s868_s6] ss:$0 sm:$0xff]  ;;  %p676_p4 = scmp.ne.s32.totalorder %s428_s29, %s675_s4  ;;  %p681_p6 = scmp.lt.s32.totalorder %s675_s4, %s675_s4 }
  0x55   :  { %498 = vmatprep.subr.bf16.mxu0 %v711_v0  ;;  %518 = vmatprep.subr.bf16.mxu1 %v711_v0 }
  0x56   :  { %p682_p7 = por %p681_p6, %p680_p5 }
  0x58   :  { %499 = vmatpush3.bf16.msra.mxu0 %v564_v5  ;;  %519 = vmatpush3.bf16.msra.mxu1 %v572_v10  ;;  %p683_p8 = pnand %p682_p7, %p676_p4 }
  0x59   :  { %500 = vmatprep.subr.bf16.mxu0 %v711_v0  ;;  %520 = vmatprep.subr.bf16.mxu1 %v711_v0 }
  0x5c   :  { %501 = vmatpush3.bf16.msra.mxu0 %v565_v7  ;;  %521 = vmatpush3.bf16.msra.mxu1 %v573_v12 }
  0x5d   :  { %502 = vmatprep.subr.bf16.mxu0 %v711_v0  ;;  %522 = vmatprep.subr.bf16.mxu1 %v711_v0 }
  0x60   :  { %503 = vmatpush3.bf16.msra.mxu0 %v566_v9  ;;  %523 = vmatpush3.bf16.msra.mxu1 %v574_v15 }
  0x61   :  { %504 = vmatprep.subr.bf16.mxu0 %v711_v0  ;;  %524 = vmatprep.subr.bf16.mxu1 %v711_v0 }
  0x64   :  { %505 = vmatpush3.bf16.msra.mxu0 %v567_v11  ;;  %525 = vmatpush3.bf16.msra.mxu1 %v575_v17 }
  0x65   :  { %506 = vmatprep.subr.bf16.mxu0 %v711_v0  ;;  %526 = vmatprep.subr.bf16.mxu1 %v711_v0 }
  0x68   :  { %507 = vmatpush3.bf16.msra.mxu0 %v568_v13  ;;  %527 = vmatpush3.bf16.msra.mxu1 %v576_v18 }
  0x69   :  { %532 = vmatprep.subr.bf16.mxu0 %v711_v0 }
  0x6b   :  { %509 = vmatmul.mubr.bf16.vlgmr.msra.gmra.mrb[0].mxu0 %v99_v16 }
  0x6c   :  { %548 = vmatprep.mubr.msk.bf16.mxu0 %vm712_vm0, %v711_v0  ;;  %533 = vmatpush3.bf16.msra.mxu0 %v577_v19 }
  0x6d   :  { %534 = vmatprep.subr.bf16.mxu0 %v711_v0 }
  0x70   :  { %535 = vmatpush3.bf16.msra.mxu0 %v578_v20 }
  0x71   :  { %536 = vmatprep.subr.bf16.mxu0 %v711_v0 }
  0x74   :  { %537 = vmatpush3.bf16.msra.mxu0 %v579_v21 }
  0x75   :  { %538 = vmatprep.subr.bf16.mxu0 %v711_v0 }
  0x78   :  { %539 = vmatpush3.bf16.msra.mxu0 %v580_v22 }
  0x79   :  { %540 = vmatprep.subr.bf16.mxu0 %v711_v0 }
  0x7c   :  { %541 = vmatpush3.bf16.msra.mxu0 %v581_v31 }
  0x7d   :  { %542 = vmatprep.subr.bf16.mxu0 %v711_v0 }
  0x80   :  { %543 = vmatpush3.bf16.msra.mxu0 %v582_v32 }
  0x81   :  { %544 = vmatprep.subr.bf16.mxu0 %v711_v0 }
  0x84   :  { %545 = vmatpush3.bf16.msra.mxu0 %v583_v33 }
  0x85   :  { %546 = vmatprep.subr.bf16.mxu0 %v711_v0 }
  0x88   :  { %547 = vmatpush3.bf16.msra.mxu0 %v584_v34 }
 0x13e   :  { %v188_v24 = vpop.f32.mrb[0].mxu0 }
 0x13f   :  { %v189_v25 = vadd.f32 %v438_v23, %v188_v24  ;;  %v510_v26 = vpop.f32.mrb[1].mxu0 }
 0x140   :  { %v191_v27 = vpop.f32.mrb[2].mxu0 }
 0x141   :  { %v194_v28 = vmax.f32 %v189_v25, 0.0  ;;  %v511_v29 = vpop.f32.mrb[3].mxu0 }
 0x143   :  { %v212_v30 = vpack.c.bf16 %v194_v28, %v194_v28 }
 0x145   :  { %529 = vmatmul.mubr.bf16.vlgmr.msra.gmra.mrb[0].mxu1 %v212_v30 }
 0x218   :  { %v301_v36 = vpop.f32.mrb[0].mxu1 }
 0x219   :  { %v302_v37 = vadd.f32 %v447_v35, %v301_v36  ;;  %v530_v38 = vpop.f32.mrb[1].mxu1 }
 0x21a   :  { %v304_v39 = vpop.f32.mrb[2].mxu1 }
 0x21b   :  { %585 = vtanh.f32 %v302_v37  ;;  %v531_v40 = vpop.f32.mrb[3].mxu1 }
 0x225   :  { %v586_v41 = vpop.eup %585 }
 0x226   :  { %v325_v42 = vpack.c.bf16 %v586_v41, %v586_v41 }
 0x228   :  { %549 = vmatmul.mubr.bf16.vlgmr.msra.gmra.mrb[4].mxu0 %v325_v42 }
 0x2fb   :  { %v414_v44 = vpop.f32.mrb[4].mxu0 }
 0x2fc   :  { %v415_v45 = vadd.f32 %v456_v43, %v414_v44  ;;  %v550_v46 = vpop.f32.mrb[5].mxu0 }
 0x2fd   :  { %v417_v47 = vpop.f32.mrb[6].mxu0 }
 0x2fe   :  { %420 = vst [vmem:[#allocation10] sm:$0xff] %v415_v45  ;;  %v551_v48 = vpop.f32.mrb[7].mxu0 }
 0x2ff   :  { %686 = shalt.err (!%p683_p8)
}
 0x300   :  { %s687_s6 = scalar_lea.hbm %s869_s7, 128 }
 0x301   :  { %p688_p9 = scmp.ne.s32.totalorder %s869_s7, %s687_s6  ;;  %p691_p10 = scmp.lt.u32.totalorder %s687_s6, %s869_s7 }
 0x303   :  { %p693_p11 = pnand %p691_p10, %p688_p9 }
 0x305   :  { %696 = shalt.err (!%p693_p11)
}
 0x306   :  { %430 = dma.vmem_to_hbm [thread:$0]  %s428_s29, 128, %s869_s7, [#allocation4]  }
 0x307   :  { %703 = dma.done.wait [#allocation4], 128  }
 0x308   :  { %704 = vsyncadd [#allocation4], 4294967168 }
 0x309   :  { %434 = vsyncpa [#allocation3], 1 }
 0x30a   :  { %435 = vsyncpa [#allocation6], 1 }
 0x30b   :  { %436 = vsyncpa [#allocation9], 1 }
 0x30c   :  { %437 = vsyncpa [#allocation4], 1 }

</bundles_post_ra>
